<compile_context>
chip_gen: v7x
topology: tpu7x:2x2x1
jax: 0.10.0
libtpu: 0.0.40
codegen_flags: <defaults>
</compile_context>

<pallas_src>
import jax
import jax.numpy as jnp
from jax.experimental import pallas as pl
from jax.experimental.pallas import tpu as pltpu

D_IN, D_H1, D_H2, D_H3, D_OUT = 16, 64, 256, 64, 1
LANES = 128
TILE_B_MAX = 2048   # multiple of 1024; safe on v5e/v6e (128 MiB) and v7x (64 MiB VMEM)


def mlp_kernel(x_ref, w1_ref, b1_ref, w2_ref, b2_ref,
               w3_ref, b3_ref, w4_ref, b4_ref, out_ref):
    """One batch tile of the fused MLP. Weights/biases are VMEM-resident."""
    x = x_ref[...]                                                  # (tb, 16)

    h = jnp.dot(x, w1_ref[...], preferred_element_type=jnp.float32) + b1_ref[...]
    h = jnp.maximum(h, 0.0)

    h = jnp.dot(h.astype(w2_ref.dtype), w2_ref[...],
                preferred_element_type=jnp.float32) + b2_ref[...]
    h = jnp.maximum(h, 0.0)

    h = jnp.dot(h.astype(w3_ref.dtype), w3_ref[...],
                preferred_element_type=jnp.float32) + b3_ref[...]
    h = jnp.maximum(h, 0.0)                                         # (tb, 64) f32

    # Layer 4 off the MXU: VPU multiply + XLU lane-reduce, with the batch
    # packed into lanes. Reshape only regroups the major (sublane) axis, so it
    # is layout-preserving; the result [r, c] is the logit of row r*128 + c.
    tb = h.shape[0]
    h3r = h.reshape(tb // LANES, LANES, D_H3)                       # (R, 128, 64)
    prod = h3r * w4_ref[...]                                        # w4: (1, 64) f32
    logits = jnp.sum(prod, axis=-1) + b4_ref[...]                   # (R, 128) + (1, 1)
    out_ref[...] = logits.astype(out_ref.dtype)


def _round_up(n, m):
    return ((n + m - 1) // m) * m


def simple_convnet_forward(x, params, tile_b=None, use_bf16=True):
    """x: (B, 16) float32; params: w1..w4 with shape (in, out), b1..b4 with shape (1, out)."""
    B, f_in = x.shape
    assert f_in == D_IN, f"expected last dim {D_IN}, got {f_in}"

    if tile_b is None:
        tile_b = TILE_B_MAX if B > TILE_B_MAX else _round_up(max(B, 1), LANES)
    assert tile_b % LANES == 0, "tile_b must be a multiple of 128"
    padded_b = _round_up(B, tile_b)
    num_tiles = padded_b // tile_b
    if num_tiles > 1:
        # Packed-output block first dim (tile_b // 128) must be a multiple of 8.
        assert tile_b % 1024 == 0, "multi-tile grids need tile_b % 1024 == 0"

    mxu_dtype = jnp.bfloat16 if use_bf16 else jnp.float32

    xk = x.astype(mxu_dtype)
    if padded_b != B:
        xk = jnp.pad(xk, ((0, padded_b - B), (0, 0)))

    w1 = params["w1"].astype(mxu_dtype)
    w2 = params["w2"].astype(mxu_dtype)
    w3 = params["w3"].astype(mxu_dtype)
    b1 = params["b1"].astype(jnp.float32)
    b2 = params["b2"].astype(jnp.float32)
    b3 = params["b3"].astype(jnp.float32)
    w4_row = params["w4"].astype(jnp.float32).reshape(1, D_H3)   # (1, 64), stays f32 (VPU)
    b4 = params["b4"].astype(jnp.float32).reshape(1, 1)

    grid = (num_tiles,)

    def batch_map(i):
        return (i, 0)

    def const_map(i):
        return (0, 0)

    # NOTE: the (tile_b, 16) x block only uses 16 of 128 lanes in VMEM; packing
    # x lane-densely only pays off for tile_b >= 4096, which we don't use.
    in_specs = [
        pl.BlockSpec((tile_b, D_IN), batch_map),          # x: streamed per tile
        pl.BlockSpec((D_IN, D_H1), const_map),            # w1 (VMEM-resident)
        pl.BlockSpec((1, D_H1), const_map),               # b1
        pl.BlockSpec((D_H1, D_H2), const_map),            # w2
        pl.BlockSpec((1, D_H2), const_map),               # b2
        pl.BlockSpec((D_H2, D_H3), const_map),            # w3
        pl.BlockSpec((1, D_H3), const_map),               # b3
        pl.BlockSpec((1, D_H3), const_map),               # w4 row
        pl.BlockSpec((1, 1), const_map),                  # b4
    ]
    out_spec = pl.BlockSpec((tile_b // LANES, LANES), batch_map)

    flops_per_row = 2 * (D_IN * D_H1 + D_H1 * D_H2 + D_H2 * D_H3 + D_H3 * D_OUT)
    weight_bytes = (w1.size + w2.size + w3.size) * jnp.dtype(mxu_dtype).itemsize \
        + 4 * (b1.size + b2.size + b3.size + w4_row.size + b4.size)
    act_bytes = padded_b * (D_IN * jnp.dtype(mxu_dtype).itemsize + 4)   # in + 4 B/row out
    cost = pl.CostEstimate(flops=flops_per_row * padded_b,
                           transcendentals=0,
                           bytes_accessed=weight_bytes + act_bytes)

    out_packed = pl.pallas_call(
        mlp_kernel,
        out_shape=jax.ShapeDtypeStruct((padded_b // LANES, LANES), jnp.float32),
        grid=grid,
        in_specs=in_specs,
        out_specs=out_spec,
        compiler_params=pltpu.CompilerParams(
            dimension_semantics=("parallel",),
            vmem_limit_bytes=32 * 1024 * 1024),
        cost_estimate=cost,
    )(xk, w1, b1, w2, b2, w3, b3, w4_row, b4)

    # Packed element [i, j] is batch row 128*i + j; flatten, drop padding.
    return out_packed.reshape(-1)[:B].reshape(B, D_OUT)


def init_params(key):
    """nn.Linear default init: U[-1/sqrt(fan_in), +1/sqrt(fan_in)] for W and b."""
    dims = [(D_IN, D_H1), (D_H1, D_H2), (D_H2, D_H3), (D_H3, D_OUT)]
    params = {}
    keys = jax.random.split(key, 2 * len(dims))
    for i, (fan_in, fan_out) in enumerate(dims):
        bound = 1.0 / (fan_in ** 0.5)
        params[f"w{i+1}"] = jax.random.uniform(
            keys[2 * i], (fan_in, fan_out),
            minval=-bound, maxval=bound, dtype=jnp.float32)
        params[f"b{i+1}"] = jax.random.uniform(
            keys[2 * i + 1], (1, fan_out),
            minval=-bound, maxval=bound, dtype=jnp.float32)
    return params


def reference_forward(x, p):
    h = jnp.maximum(x @ p["w1"] + p["b1"], 0.0)
    h = jnp.maximum(h @ p["w2"] + p["b2"], 0.0)
    h = jnp.maximum(h @ p["w3"] + p["b3"], 0.0)
    return h @ p["w4"] + p["b4"]


if __name__ == "__main__":
    key = jax.random.PRNGKey(0)
    k_params, k_x = jax.random.split(key)

    params = init_params(k_params)

    # Small batch (single grid step), bf16 MXU operands.
    B = 8
    x = jax.random.normal(k_x, (B, D_IN), dtype=jnp.float32)
    out = jax.block_until_ready(simple_convnet_forward(x, params))
    ref = reference_forward(x, params)
    assert out.shape == (B, D_OUT), out.shape
    assert jnp.allclose(out, ref, atol=5e-2, rtol=5e-2), "mismatch vs reference (bf16)"

    # Exact f32 path matches tightly.
    out_f32 = jax.block_until_ready(simple_convnet_forward(x, params, use_bf16=False))
    assert jnp.allclose(out_f32, ref, atol=1e-5, rtol=1e-5), "mismatch vs reference (f32)"

    # Ragged batch (padded to 128 rows inside the wrapper).
    B2 = 37
    x2 = jax.random.normal(jax.random.PRNGKey(1), (B2, D_IN), dtype=jnp.float32)
    out2 = jax.block_until_ready(simple_convnet_forward(x2, params))
    ref2 = reference_forward(x2, params)
    assert out2.shape == (B2, D_OUT), out2.shape
    assert jnp.allclose(out2, ref2, atol=5e-2, rtol=5e-2), "mismatch vs reference (ragged)"

    # Multi-tile grid path (3 grid steps, ragged last tile).
    B3 = 2500
    x3 = jax.random.normal(jax.random.PRNGKey(2), (B3, D_IN), dtype=jnp.float32)
    out3 = jax.block_until_ready(simple_convnet_forward(x3, params, tile_b=1024))
    ref3 = reference_forward(x3, params)
    assert out3.shape == (B3, D_OUT), out3.shape
    assert jnp.allclose(out3, ref3, atol=5e-2, rtol=5e-2), "mismatch vs reference (multi-tile)"

    print("KERNEL_OK")
</pallas_src>

<mosaic_0001>
module attributes {stable_mosaic.version = 11 : i64} {
  func.func @mlp_kernel(%arg0: i32, %arg1: memref<128x16xbf16, #tpu.memory_space<vmem>>, %arg2: memref<16x64xbf16, #tpu.memory_space<vmem>>, %arg3: memref<1x64xf32, #tpu.memory_space<vmem>>, %arg4: memref<64x256xbf16, #tpu.memory_space<vmem>>, %arg5: memref<1x256xf32, #tpu.memory_space<vmem>>, %arg6: memref<256x64xbf16, #tpu.memory_space<vmem>>, %arg7: memref<1x64xf32, #tpu.memory_space<vmem>>, %arg8: memref<1x64xf32, #tpu.memory_space<vmem>>, %arg9: memref<1x1xf32, #tpu.memory_space<vmem>>, %arg10: memref<1x128xf32, #tpu.memory_space<vmem>>) attributes {dimension_semantics = [#tpu.dimension_semantics<parallel>], iteration_bounds = array<i64: 1>, scalar_prefetch = 0 : i64, scratch_operands = 0 : i64, tpu.core_type = #tpu.core_type<tc>, window_params = [{transform_indices = @transform_0, window_bounds = array<i64: 128, 16>}, {pipeline_mode = #tpu.pipeline_mode<synchronous>, transform_indices = @transform_1, window_bounds = array<i64: 16, 64>}, {pipeline_mode = #tpu.pipeline_mode<synchronous>, transform_indices = @transform_2, window_bounds = array<i64: 1, 64>}, {pipeline_mode = #tpu.pipeline_mode<synchronous>, transform_indices = @transform_3, window_bounds = array<i64: 64, 256>}, {pipeline_mode = #tpu.pipeline_mode<synchronous>, transform_indices = @transform_4, window_bounds = array<i64: 1, 256>}, {pipeline_mode = #tpu.pipeline_mode<synchronous>, transform_indices = @transform_5, window_bounds = array<i64: 256, 64>}, {pipeline_mode = #tpu.pipeline_mode<synchronous>, transform_indices = @transform_6, window_bounds = array<i64: 1, 64>}, {pipeline_mode = #tpu.pipeline_mode<synchronous>, transform_indices = @transform_7, window_bounds = array<i64: 1, 64>}, {pipeline_mode = #tpu.pipeline_mode<synchronous>, transform_indices = @transform_8, window_bounds = array<i64: 1, 1>}, {transform_indices = @transform_9, window_bounds = array<i64: 1, 128>}]} {
    %c0 = arith.constant 0 : index
    %c0_0 = arith.constant 0 : index
    %0 = vector.load %arg1[%c0, %c0_0] : memref<128x16xbf16, #tpu.memory_space<vmem>>, vector<128x16xbf16>
    %c0_1 = arith.constant 0 : index
    %c0_2 = arith.constant 0 : index
    %1 = vector.load %arg2[%c0_1, %c0_2] : memref<16x64xbf16, #tpu.memory_space<vmem>>, vector<16x64xbf16>
    %cst = arith.constant dense<0.000000e+00> : vector<128x64xf32>
    %2 = tpu.matmul %0, %1, %cst {dimension_numbers = #tpu.dot_dimension_numbers<[1], [0], [0], [1], [0, 0, 1, 1], [], []>} : vector<128x16xbf16>, vector<16x64xbf16>, vector<128x64xf32> -> vector<128x64xf32>
    %c0_3 = arith.constant 0 : index
    %c0_4 = arith.constant 0 : index
    %3 = vector.load %arg3[%c0_3, %c0_4] : memref<1x64xf32, #tpu.memory_space<vmem>>, vector<1x64xf32>
    %4 = vector.broadcast %3 : vector<1x64xf32> to vector<128x64xf32>
    %5 = arith.addf %2, %4 : vector<128x64xf32>
    %cst_5 = arith.constant 0.000000e+00 : f32
    %6 = vector.broadcast %cst_5 : f32 to vector<128x64xf32>
    %7 = arith.maximumf %5, %6 : vector<128x64xf32>
    %8 = arith.truncf %7 : vector<128x64xf32> to vector<128x64xbf16>
    %c0_6 = arith.constant 0 : index
    %c0_7 = arith.constant 0 : index
    %9 = vector.load %arg4[%c0_6, %c0_7] : memref<64x256xbf16, #tpu.memory_space<vmem>>, vector<64x256xbf16>
    %cst_8 = arith.constant dense<0.000000e+00> : vector<128x256xf32>
    %10 = tpu.matmul %8, %9, %cst_8 {dimension_numbers = #tpu.dot_dimension_numbers<[1], [0], [0], [1], [0, 0, 1, 1], [], []>} : vector<128x64xbf16>, vector<64x256xbf16>, vector<128x256xf32> -> vector<128x256xf32>
    %c0_9 = arith.constant 0 : index
    %c0_10 = arith.constant 0 : index
    %11 = vector.load %arg5[%c0_9, %c0_10] : memref<1x256xf32, #tpu.memory_space<vmem>>, vector<1x256xf32>
    %12 = vector.broadcast %11 : vector<1x256xf32> to vector<128x256xf32>
    %13 = arith.addf %10, %12 : vector<128x256xf32>
    %cst_11 = arith.constant 0.000000e+00 : f32
    %14 = vector.broadcast %cst_11 : f32 to vector<128x256xf32>
    %15 = arith.maximumf %13, %14 : vector<128x256xf32>
    %16 = arith.truncf %15 : vector<128x256xf32> to vector<128x256xbf16>
    %c0_12 = arith.constant 0 : index
    %c0_13 = arith.constant 0 : index
    %17 = vector.load %arg6[%c0_12, %c0_13] : memref<256x64xbf16, #tpu.memory_space<vmem>>, vector<256x64xbf16>
    %cst_14 = arith.constant dense<0.000000e+00> : vector<128x64xf32>
    %18 = tpu.matmul %16, %17, %cst_14 {dimension_numbers = #tpu.dot_dimension_numbers<[1], [0], [0], [1], [0, 0, 1, 1], [], []>} : vector<128x256xbf16>, vector<256x64xbf16>, vector<128x64xf32> -> vector<128x64xf32>
    %c0_15 = arith.constant 0 : index
    %c0_16 = arith.constant 0 : index
    %19 = vector.load %arg7[%c0_15, %c0_16] : memref<1x64xf32, #tpu.memory_space<vmem>>, vector<1x64xf32>
    %20 = vector.broadcast %19 : vector<1x64xf32> to vector<128x64xf32>
    %21 = arith.addf %18, %20 : vector<128x64xf32>
    %cst_17 = arith.constant 0.000000e+00 : f32
    %22 = vector.broadcast %cst_17 : f32 to vector<128x64xf32>
    %23 = arith.maximumf %21, %22 : vector<128x64xf32>
    %24 = vector.shape_cast %23 : vector<128x64xf32> to vector<1x128x64xf32>
    %c0_18 = arith.constant 0 : index
    %c0_19 = arith.constant 0 : index
    %25 = vector.load %arg8[%c0_18, %c0_19] : memref<1x64xf32, #tpu.memory_space<vmem>>, vector<1x64xf32>
    %26 = vector.shape_cast %25 : vector<1x64xf32> to vector<1x1x64xf32>
    %27 = vector.broadcast %26 : vector<1x1x64xf32> to vector<1x128x64xf32>
    %28 = arith.mulf %24, %27 : vector<1x128x64xf32>
    %cst_20 = arith.constant dense<0.000000e+00> : vector<1x128xf32>
    %29 = vector.multi_reduction <add>, %28, %cst_20 [2] : vector<1x128x64xf32> to vector<1x128xf32>
    %c0_21 = arith.constant 0 : index
    %c0_22 = arith.constant 0 : index
    %30 = vector.load %arg9[%c0_21, %c0_22] : memref<1x1xf32, #tpu.memory_space<vmem>>, vector<1x1xf32>
    %31 = vector.broadcast %30 : vector<1x1xf32> to vector<1x128xf32>
    %32 = arith.addf %29, %31 : vector<1x128xf32>
    %c0_23 = arith.constant 0 : index
    %c0_24 = arith.constant 0 : index
    %33 = vector.load %arg10[%c0_23, %c0_24] : memref<1x128xf32, #tpu.memory_space<vmem>>, vector<1x128xf32>
    tpu.vector_store %arg10[%c0_23, %c0_24], %32 {strides = array<i32>} : memref<1x128xf32, #tpu.memory_space<vmem>>, vector<1x128xf32>,
    return
  }
  func.func @transform_0(%arg0: i32) -> (i32, i32) {
    %c0_i32 = arith.constant 0 : i32
    %c0_i32_0 = arith.constant 0 : i32
    return %arg0, %c0_i32 : i32, i32
  }
  func.func @transform_1(%arg0: i32) -> (i32, i32) {
    %c0_i32 = arith.constant 0 : i32
    %c0_i32_0 = arith.constant 0 : i32
    %c0_i32_1 = arith.constant 0 : i32
    return %c0_i32, %c0_i32_0 : i32, i32
  }
  func.func @transform_2(%arg0: i32) -> (i32, i32) {
    %c0_i32 = arith.constant 0 : i32
    %c0_i32_0 = arith.constant 0 : i32
    %c0_i32_1 = arith.constant 0 : i32
    return %c0_i32, %c0_i32_0 : i32, i32
  }
  func.func @transform_3(%arg0: i32) -> (i32, i32) {
    %c0_i32 = arith.constant 0 : i32
    %c0_i32_0 = arith.constant 0 : i32
    %c0_i32_1 = arith.constant 0 : i32
    return %c0_i32, %c0_i32_0 : i32, i32
  }
  func.func @transform_4(%arg0: i32) -> (i32, i32) {
    %c0_i32 = arith.constant 0 : i32
    %c0_i32_0 = arith.constant 0 : i32
    %c0_i32_1 = arith.constant 0 : i32
    return %c0_i32, %c0_i32_0 : i32, i32
  }
  func.func @transform_5(%arg0: i32) -> (i32, i32) {
    %c0_i32 = arith.constant 0 : i32
    %c0_i32_0 = arith.constant 0 : i32
    %c0_i32_1 = arith.constant 0 : i32
    return %c0_i32, %c0_i32_0 : i32, i32
  }
  func.func @transform_6(%arg0: i32) -> (i32, i32) {
    %c0_i32 = arith.constant 0 : i32
    %c0_i32_0 = arith.constant 0 : i32
    %c0_i32_1 = arith.constant 0 : i32
    return %c0_i32, %c0_i32_0 : i32, i32
  }
  func.func @transform_7(%arg0: i32) -> (i32, i32) {
    %c0_i32 = arith.constant 0 : i32
    %c0_i32_0 = arith.constant 0 : i32
    %c0_i32_1 = arith.constant 0 : i32
    return %c0_i32, %c0_i32_0 : i32, i32
  }
  func.func @transform_8(%arg0: i32) -> (i32, i32) {
    %c0_i32 = arith.constant 0 : i32
    %c0_i32_0 = arith.constant 0 : i32
    %c0_i32_1 = arith.constant 0 : i32
    return %c0_i32, %c0_i32_0 : i32, i32
  }
  func.func @transform_9(%arg0: i32) -> (i32, i32) {
    %c0_i32 = arith.constant 0 : i32
    %c0_i32_0 = arith.constant 0 : i32
    return %arg0, %c0_i32 : i32, i32
  }
}

</mosaic_0001>

<bundles_post_ra>
// kernel: tpu_custom_call.1
= control target key start
LH: loop header
LB: loop body
LE: loop exit
PB: predicated region body
PF: predicated region fallthrough
CT: control target
= control target key end

     0   :  { %s1606_s0 = inlined_call_operand.vmem [shape: bf16[128,16], index: 0, kind: input, shape index: {}]   ;;  %s1607_s1 = inlined_call_operand.vmem [shape: bf16[16,64], index: 1, kind: input, shape index: {}]   ;;  %s1608_s2 = inlined_call_operand.vmem [shape: f32[1,64], index: 2, kind: input, shape index: {}]   ;;  %s1609_s3 = inlined_call_operand.vmem [shape: bf16[64,256], index: 3, kind: input, shape index: {}]   ;;  %s1610_s4 = inlined_call_operand.vmem [shape: f32[1,256], index: 4, kind: input, shape index: {}]   ;;  %s1611_s5 = inlined_call_operand.vmem [shape: bf16[256,64], index: 5, kind: input, shape index: {}]   ;;  %s1612_s6 = inlined_call_operand.vmem [shape: f32[1,64], index: 6, kind: input, shape index: {}]   ;;  %s1613_s7 = inlined_call_operand.vmem [shape: f32[1,64], index: 7, kind: input, shape index: {}]   ;;  %s1614_s8 = inlined_call_operand.<no memory space> [shape: f32[1,1], index: 8, kind: input, shape index: {}]   ;;  %s1615_s9 = inlined_call_operand.hbm [shape: f32[1,128], index: 9, kind: output, shape index: {}]  }
   0x1   :  { %v14_v0 = vstv %s1614_s8 }
   0x2   :  { %15 = vst [vmem:[#allocation2] sm:$0x1] %v14_v0 }
   0x3   :  { %v1150_v1 = vld [vmem:[%s1607_s1] sm:$0xff]   ;;  %vm107_vm0 = vcmask 130048   ;;  %v1152_v3 = vld [vmem:[%s1606_s0 + $0x8] sm:$0xff]   ;;  %v1153_v4 = vld [vmem:[%s1606_s0 + $0x10] sm:$0xff]  }
   0x4   :  { %v1151_v2 = vld [vmem:[%s1606_s0] sm:$0xff]   ;;  %1112 = vmatprep.subr.bf16.mxu0 %v1150_v1  ;;  %v1154_v5 = vld [vmem:[%s1606_s0 + $0x18] sm:$0xff]   ;;  %v1156_v11 = vld [vmem:[%s1606_s0 + $0x28] sm:$0xff]  }
   0x5   :  { %1113 = vmatpush3.bf16.msra.mxu0 %v1150_v1  ;;  %1114 = vmatprep.mubr.msk.bf16.mxu0 %vm107_vm0, %v1151_v2  ;;  %v1155_v6 = vld [vmem:[%s1606_s0 + $0x20] sm:$0xff]   ;;  %v1162_v9 = vld [vmem:[%s1609_s3 + $0x14] ss:$8 sps:$4 sm:$0xff]   ;;  %v1164_v10 = vld [vmem:[%s1609_s3 + $0x10] ss:$8 sps:$4 sm:$0xff]  }
   0x6   :  { %v1159_v7 = vld [vmem:[%s1609_s3 + $0x4] ss:$8 sps:$4 sm:$0xff]   ;;  %v1161_v8 = vld [vmem:[%s1609_s3] ss:$8 sps:$4 sm:$0xff]   ;;  %v1157_v12 = vld [vmem:[%s1606_s0 + $0x30] sm:$0xff]  }
   0x7   :  { %338 = vmatprep.subr.bf16.mxu1 %v1159_v7 }
   0x8   :  { %1115 = vmatmul.mubr.msk.bf16.vlgmr.msra.gmra.mrb[0].mxu0 %vm107_vm0, %v1152_v3  ;;  %339 = vmatpush1.bf16.msra.mxu1 %v1161_v8 }
   0x9   :  { %1118 = vmatprep.mubr.msk.bf16.mxu0 %vm107_vm0, %v1153_v4  ;;  %340 = vmatprep.subr.bf16.mxu1 %v1162_v9 }
   0xc   :  { %341 = vmatpush1.bf16.msra.mxu1 %v1164_v10 }
  0x10   :  { %1119 = vmatmul.mubr.msk.bf16.gmra.mrb[4].mxu0 %vm107_vm0, %v1154_v5 }
  0x11   :  { %1122 = vmatprep.mubr.msk.bf16.mxu0 %vm107_vm0, %v1155_v6 }
  0x18   :  { %1123 = vmatmul.mubr.msk.bf16.gmra.mrb[8].mxu0 %vm107_vm0, %v1156_v11 }
  0x19   :  { %1126 = vmatprep.mubr.msk.bf16.mxu0 %vm107_vm0, %v1157_v12 }
  0x1a   :  { %16 = vsyncpa [#allocation4], 0  ;;  %v1158_v13 = vld [vmem:[%s1606_s0 + $0x38] sm:$0xff]   ;;  %v1165_v14 = vld [vmem:[%s1609_s3 + $0x24] ss:$8 sps:$4 sm:$0xff]   ;;  %v1211_v18 = vmov 0  }
  0x1b   :  { %v1167_v15 = vld [vmem:[%s1609_s3 + $0x20] ss:$8 sps:$4 sm:$0xff]   ;;  %342 = vmatprep.subr.bf16.mxu1 %v1165_v14  ;;  %v1168_v16 = vld [vmem:[%s1609_s3 + $0x34] ss:$8 sps:$4 sm:$0xff]   ;;  %v1170_v17 = vld [vmem:[%s1609_s3 + $0x30] ss:$8 sps:$4 sm:$0xff]   ;;  %370 = vmatprep.mubr.bf16.mxu1 %v1211_v18 }
  0x1c   :  { %343 = vmatpush1.bf16.msra.mxu1 %v1167_v15  ;;  %1148 = vset.pattern.permute.xlu1 %v1211_v18  ;;  %v1171_v19 = vld [vmem:[%s1611_s5 + $0x40] sm:$0xff]   ;;  %v1173_v21 = vld [vmem:[%s1611_s5 + $0x48] sm:$0xff]   ;;  %v1175_v23 = vld [vmem:[%s1611_s5 + $0x50] sm:$0xff]   ;;  %vm313_vm1 = vcmask 523264   ;;  %vm871_vm2 = vcmask 130112   ;;  %vm878_vm3 = vcmask 195712  }
  0x1d   :  { %344 = vmatprep.subr.bf16.mxu1 %v1168_v16  ;;  %1149 = vset.pattern.permute.xlu0 %v1211_v18  ;;  %v1172_v20 = vld [vmem:[%s1611_s5] sm:$0xff]   ;;  %v1174_v22 = vld [vmem:[%s1611_s5 + $0x8] sm:$0xff]   ;;  %v1176_v24 = vld [vmem:[%s1611_s5 + $0x10] sm:$0xff]   ;;  %vm885_vm4 = vcmask 261312   ;;  %vm892_vm5 = vcmask 326912   ;;  %vm899_vm6 = vcmask 392512  }
  0x1e   :  { %1048 = vmatprep.subr.bf16.mxu0 %v1171_v19  ;;  %v1177_v25 = vld [vmem:[%s1611_s5 + $0x58] sm:$0xff]   ;;  %v1357_v27 = vld [vmem:[%s1611_s5 + $0x60] sm:$0xff]   ;;  %v1369_v29 = vld [vmem:[%s1611_s5 + $0x68] sm:$0xff]   ;;  %vm906_vm7 = vcmask 458112   ;;  %vm913_vm8 = vcmask 523712   ;;  %vm920_vm9 = vcmask 589312  }
  0x1f   :  { %1049 = vmatpush3.bf16.msra.mxu0 %v1172_v20  ;;  %v1352_v26 = vld [vmem:[%s1611_s5 + $0x18] sm:$0xff]   ;;  %v1363_v28 = vld [vmem:[%s1611_s5 + $0x20] sm:$0xff]   ;;  %v1375_v30 = vld [vmem:[%s1611_s5 + $0x28] sm:$0xff]   ;;  %vm927_vm10 = vcmask 654912   ;;  %vm934_vm11 = vcmask 720512   ;;  %vm941_vm12 = vcmask 786112  }
  0x20   :  { %1127 = vmatmul.mubr.msk.bf16.gmra.mrb[12].mxu0 %vm107_vm0, %v1158_v13  ;;  %345 = vmatpush1.bf16.msra.mxu1 %v1170_v17  ;;  %v1382_v31 = vld [vmem:[%s1608_s2] ss:$0 sm:$0xff]  ;;  %vm948_vm13 = vcmask 851712   ;;  %vm955_vm14 = vcmask 917312   ;;  %vm962_vm15 = vcmask 982912   ;;  %vm969_vm0 = vcmask 1048512  }
  0x21   :  { %1130 = vmatprep.subr.bf16.mxu1 %v1171_v19  ;;  %1050 = vmatprep.subr.bf16.mxu0 %v1173_v21 }
  0x23   :  { %1051 = vmatpush3.bf16.msra.mxu0 %v1174_v22 }
  0x24   :  { %1052 = vmatprep.subr.bf16.mxu0 %v1175_v23 }
  0x27   :  { %1053 = vmatpush3.bf16.msra.mxu0 %v1176_v24 }
  0x28   :  { %1054 = vmatprep.subr.bf16.mxu0 %v1177_v25 }
  0x2b   :  { %1055 = vmatpush3.bf16.msra.mxu0 %v1352_v26 }
  0x2c   :  { %1056 = vmatprep.subr.bf16.mxu0 %v1357_v27 }
  0x2f   :  { %1057 = vmatpush3.bf16.msra.mxu0 %v1363_v28 }
  0x30   :  { %1058 = vmatprep.subr.bf16.mxu0 %v1369_v29 }
  0x33   :  { %1059 = vmatpush3.bf16.msra.mxu0 %v1375_v30 }
  0xdb   :  { %v1116_v32 = vpop.f32.mrb[0].mxu0 }
  0xdc   :  { %v175_v33 = vadd.f32 %v1116_v32, %v1382_v31  ;;  %v166_v34 = vpop.f32.mrb[1].mxu0 }
  0xdd   :  { %v167_v35 = vadd.f32 %v1382_v31, %v166_v34  ;;  %v1117_v36 = vpop.f32.mrb[2].mxu0 }
  0xde   :  { %v178_v37 = vadd.f32 %v1117_v36, %v1382_v31  ;;  %v169_v38 = vpop.f32.mrb[3].mxu0  ;;  %v231_v40 = vmax.f32 %v175_v33, 0.0 }
  0xdf   :  { %v170_v39 = vadd.f32 %v1382_v31, %v169_v38  ;;  %v229_v42 = vmax.f32 %v167_v35, 0.0 }
  0xe0   :  { %v232_v41 = vmax.f32 %v178_v37, 0.0 }
  0xe1   :  { %v230_v43 = vmax.f32 %v170_v39, 0.0 }
  0xe2   :  { %v246_v44 = vpack.c.bf16 %v232_v41, %v231_v40 }
  0xe3   :  { %v245_v45 = vpack.c.bf16 %v230_v43, %v229_v42  ;;  %v1120_v46 = vpop.f32.mrb[4].mxu0 }
  0xe4   :  { %v191_v47 = vadd.f32 %v1120_v46, %v1382_v31  ;;  %v182_v48 = vpop.f32.mrb[5].mxu0 }
  0xe5   :  { %1013 = vmatmul.mubr.msk.bf16.vlgmr.msra.gmra.mrb[0].mxu1 %vm313_vm1, %v245_v45  ;;  %v183_v49 = vadd.f32 %v1382_v31, %v182_v48  ;;  %v1121_v50 = vpop.f32.mrb[6].mxu0 }
  0xe6   :  { %v235_v51 = vmax.f32 %v191_v47, 0.0  ;;  %v194_v52 = vadd.f32 %v1121_v50, %v1382_v31  ;;  %v185_v53 = vpop.f32.mrb[7].mxu0  ;;  %380 = vmatprep.mubr.bf16.mxu1 %v1211_v18  ;;  %1138 = vmatpush3.bf16.msra.mxu1 %v1172_v20 }
  0xe7   :  { %v233_v54 = vmax.f32 %v183_v49, 0.0  ;;  %v186_v55 = vadd.f32 %v1382_v31, %v185_v53  ;;  %1131 = vmatprep.subr.bf16.mxu1 %v1173_v21 }
  0xe8   :  { %v236_v56 = vmax.f32 %v194_v52, 0.0 }
  0xe9   :  { %v234_v57 = vmax.f32 %v186_v55, 0.0 }
  0xea   :  { %v248_v58 = vpack.c.bf16 %v236_v56, %v235_v51  ;;  %1139 = vmatpush3.bf16.msra.mxu1 %v1174_v22 }
  0xeb   :  { %v247_v59 = vpack.c.bf16 %v234_v57, %v233_v54  ;;  %v1124_v60 = vpop.f32.mrb[8].mxu0  ;;  %1132 = vmatprep.subr.bf16.mxu1 %v1175_v23 }
  0xec   :  { %v207_v61 = vadd.f32 %v1124_v60, %v1382_v31  ;;  %v198_v62 = vpop.f32.mrb[9].mxu0 }
  0xed   :  { %1014 = vmatmul.mubr.msk.bf16.gmra.mrb[4].mxu1 %vm313_vm1, %v246_v44  ;;  %v199_v63 = vadd.f32 %v1382_v31, %v198_v62  ;;  %v1125_v0 = vpop.f32.mrb[10].mxu0 }
  0xee   :  { %390 = vmatprep.mubr.bf16.mxu1 %v1211_v18  ;;  %v239_v1 = vmax.f32 %v207_v61, 0.0  ;;  %v210_v2 = vadd.f32 %v1125_v0, %v1382_v31  ;;  %v201_v3 = vpop.f32.mrb[11].mxu0  ;;  %1140 = vmatpush3.bf16.msra.mxu1 %v1176_v24 }
  0xef   :  { %v237_v4 = vmax.f32 %v199_v63, 0.0  ;;  %v202_v5 = vadd.f32 %v1382_v31, %v201_v3  ;;  %1133 = vmatprep.subr.bf16.mxu1 %v1177_v25  ;;  %v1183_v25 = vld [vmem:[%s1611_s5 + $0x70] sm:$0xff]  }
  0xf0   :  { %v240_v6 = vmax.f32 %v210_v2, 0.0  ;;  %1060 = vmatprep.subr.bf16.mxu0 %v1183_v25 }
  0xf1   :  { %v238_v7 = vmax.f32 %v202_v5, 0.0 }
  0xf2   :  { %v250_v8 = vpack.c.bf16 %v240_v6, %v239_v1  ;;  %1141 = vmatpush3.bf16.msra.mxu1 %v1352_v26  ;;  %v1184_v26 = vld [vmem:[%s1611_s5 + $0x30] sm:$0xff]  }
  0xf3   :  { %v249_v9 = vpack.c.bf16 %v238_v7, %v237_v4  ;;  %v1128_v10 = vpop.f32.mrb[12].mxu0  ;;  %1134 = vmatprep.subr.bf16.mxu1 %v1357_v27  ;;  %1061 = vmatpush3.bf16.msra.mxu0 %v1184_v26  ;;  %v1185_v27 = vld [vmem:[%s1611_s5 + $0x78] sm:$0xff]  }
  0xf4   :  { %v223_v11 = vadd.f32 %v1128_v10, %v1382_v31  ;;  %v214_v12 = vpop.f32.mrb[13].mxu0  ;;  %1062 = vmatprep.subr.bf16.mxu0 %v1185_v27 }
  0xf5   :  { %1015 = vmatmul.mubr.msk.bf16.gmra.mrb[8].mxu1 %vm313_vm1, %v247_v59  ;;  %v215_v13 = vadd.f32 %v1382_v31, %v214_v12  ;;  %v1129_v14 = vpop.f32.mrb[14].mxu0 }
  0xf6   :  { %400 = vmatprep.mubr.bf16.mxu1 %v1211_v18  ;;  %v243_v15 = vmax.f32 %v223_v11, 0.0  ;;  %v226_v16 = vadd.f32 %v1129_v14, %v1382_v31  ;;  %v217_v17 = vpop.f32.mrb[15].mxu0  ;;  %1142 = vmatpush3.bf16.msra.mxu1 %v1363_v28  ;;  %v263_v28 = vlaneseq }
  0xf7   :  { %v241_v19 = vmax.f32 %v215_v13, 0.0  ;;  %v218_v20 = vadd.f32 %v1382_v31, %v217_v17  ;;  %1135 = vmatprep.subr.bf16.mxu1 %v1369_v29  ;;  %v261_v31 = vld [vmem:[%s1610_s4] sm:$0x3] }
  0xf8   :  { %v244_v21 = vmax.f32 %v226_v16, 0.0  ;;  %v1433_v29 = vshrl.u32 %v263_v28, 7 }
  0xf9   :  { %v242_v22 = vmax.f32 %v218_v20, 0.0 }
  0xfa   :  { %v252_v23 = vpack.c.bf16 %v244_v21, %v243_v15  ;;  %1143 = vmatpush3.bf16.msra.mxu1 %v1375_v30  ;;  %v265_v30 = vsub.s32 0, %v1433_v29  ;;  %v269_v32 = vsub.s32 1, %v1433_v29 }
  0xfb   :  { %v251_v24 = vpack.c.bf16 %v242_v22, %v241_v19  ;;  %1136 = vmatprep.subr.bf16.mxu1 %v1183_v25 }
  0xfc   :  { %v1442_v33 = vrot.slane %v261_v31, %v265_v30  ;;  %v1444_v34 = vrot.slane %v261_v31, %v269_v32 }
  0xfd   :  { %1016 = vmatmul.mubr.msk.bf16.gmra.mrb[12].mxu1 %vm313_vm1, %v248_v58 }
  0xfe   :  { %410 = vmatprep.mubr.bf16.mxu1 %v1211_v18  ;;  %1144 = vmatpush3.bf16.msra.mxu1 %v1184_v26 }
  0xff   :  { %1137 = vmatprep.subr.bf16.mxu1 %v1185_v27 }
 0x105   :  { %1017 = vmatmul.mubr.msk.bf16.gmra.mrb[16].mxu1 %vm313_vm1, %v249_v9 }
 0x106   :  { %420 = vmatprep.mubr.bf16.mxu1 %v1211_v18 }
 0x10d   :  { %1018 = vmatmul.mubr.msk.bf16.gmra.mrb[20].mxu1 %vm313_vm1, %v250_v8 }
 0x10e   :  { %430 = vmatprep.mubr.bf16.mxu1 %v1211_v18 }
 0x115   :  { %1019 = vmatmul.mubr.msk.bf16.gmra.mrb[24].mxu1 %vm313_vm1, %v251_v24 }
 0x116   :  { %440 = vmatprep.mubr.bf16.mxu1 %v1211_v18  ;;  %v1186_v18 = vld [vmem:[%s1611_s5 + $0x38] sm:$0xff]  }
 0x117   :  { %1063 = vmatpush3.bf16.msra.mxu0 %v1186_v18  ;;  %1145 = vmatpush3.bf16.msra.mxu1 %v1186_v18 }
 0x11d   :  { %1020 = vmatmul.mubr.msk.bf16.gmra.mrb[28].mxu1 %vm313_vm1, %v252_v23 }
 0x1b8   :  { %v372_v35 = vpop.f32.mrb[0].mxu1 }
 0x1b9   :  { %v373_v36 = vadd.f32 %v372_v35, %v1442_v33  ;;  %v374_v37 = vpop.f32.mrb[1].mxu1 }
 0x1ba   :  { %v375_v38 = vadd.f32 %v374_v37, %v1444_v34  ;;  %v376_v39 = vpop.f32.mrb[2].mxu1 }
 0x1bb   :  { %v377_v40 = vadd.f32 %v376_v39, %v1442_v33  ;;  %v378_v41 = vpop.f32.mrb[3].mxu1  ;;  %v451_v43 = vmax.f32 %v373_v36, 0.0 }
 0x1bc   :  { %v379_v42 = vadd.f32 %v378_v41, %v1444_v34  ;;  %v452_v45 = vmax.f32 %v375_v38, 0.0 }
 0x1bd   :  { %v453_v44 = vmax.f32 %v377_v40, 0.0 }
 0x1be   :  { %v454_v46 = vmax.f32 %v379_v42, 0.0 }
 0x1bf   :  { %v483_v47 = vpack.c.bf16 %v453_v44, %v451_v43 }
 0x1c0   :  { %v484_v48 = vpack.c.bf16 %v454_v46, %v452_v45  ;;  %v382_v49 = vpop.f32.mrb[4].mxu1 }
 0x1c1   :  { %v383_v50 = vadd.f32 %v382_v49, %v1442_v33  ;;  %v384_v51 = vpop.f32.mrb[5].mxu1 }
 0x1c2   :  { %v385_v52 = vadd.f32 %v384_v51, %v1444_v34  ;;  %v386_v53 = vpop.f32.mrb[6].mxu1  ;;  %666 = vmatprep.mubr.bf16.mxu0 %v484_v48 }
 0x1c3   :  { %v387_v54 = vadd.f32 %v386_v53, %v1442_v33  ;;  %v388_v55 = vpop.f32.mrb[7].mxu1  ;;  %667 = vmatmul.mubr.bf16.vlgmr.msra.gmra.mrb[16].mxu0 %v483_v47  ;;  %v455_v57 = vmax.f32 %v383_v50, 0.0 }
 0x1c4   :  { %v389_v56 = vadd.f32 %v388_v55, %v1444_v34  ;;  %v456_v59 = vmax.f32 %v385_v52, 0.0 }
 0x1c5   :  { %v457_v58 = vmax.f32 %v387_v54, 0.0 }
 0x1c6   :  { %v458_v60 = vmax.f32 %v389_v56, 0.0 }
 0x1c7   :  { %v485_v61 = vpack.c.bf16 %v457_v58, %v455_v57 }
 0x1c8   :  { %v486_v62 = vpack.c.bf16 %v458_v60, %v456_v59  ;;  %v392_v63 = vpop.f32.mrb[8].mxu1 }
 0x1c9   :  { %v393_v0 = vadd.f32 %v392_v63, %v1442_v33  ;;  %v394_v1 = vpop.f32.mrb[9].mxu1 }
 0x1ca   :  { %v395_v2 = vadd.f32 %v394_v1, %v1444_v34  ;;  %v396_v3 = vpop.f32.mrb[10].mxu1  ;;  %674 = vmatprep.mubr.bf16.mxu0 %v486_v62 }
 0x1cb   :  { %v397_v4 = vadd.f32 %v396_v3, %v1442_v33  ;;  %v398_v5 = vpop.f32.mrb[11].mxu1  ;;  %675 = vmatmul.mubr.bf16.gmra.mrb[20].mxu0 %v485_v61  ;;  %v459_v7 = vmax.f32 %v393_v0, 0.0 }
 0x1cc   :  { %v399_v6 = vadd.f32 %v398_v5, %v1444_v34  ;;  %v460_v9 = vmax.f32 %v395_v2, 0.0 }
 0x1cd   :  { %v461_v8 = vmax.f32 %v397_v4, 0.0 }
 0x1ce   :  { %v462_v10 = vmax.f32 %v399_v6, 0.0 }
 0x1cf   :  { %v487_v11 = vpack.c.bf16 %v461_v8, %v459_v7 }
 0x1d0   :  { %v488_v12 = vpack.c.bf16 %v462_v10, %v460_v9  ;;  %v402_v13 = vpop.f32.mrb[12].mxu1 }
 0x1d1   :  { %v403_v14 = vadd.f32 %v402_v13, %v1442_v33  ;;  %v404_v15 = vpop.f32.mrb[13].mxu1 }
 0x1d2   :  { %v405_v16 = vadd.f32 %v404_v15, %v1444_v34  ;;  %v406_v17 = vpop.f32.mrb[14].mxu1  ;;  %682 = vmatprep.mubr.bf16.mxu0 %v488_v12 }
 0x1d3   :  { %v407_v19 = vadd.f32 %v406_v17, %v1442_v33  ;;  %v408_v20 = vpop.f32.mrb[15].mxu1  ;;  %683 = vmatmul.mubr.bf16.gmra.mrb[24].mxu0 %v487_v11  ;;  %v463_v22 = vmax.f32 %v403_v14, 0.0 }
 0x1d4   :  { %v409_v21 = vadd.f32 %v408_v20, %v1444_v34  ;;  %v464_v24 = vmax.f32 %v405_v16, 0.0 }
 0x1d5   :  { %v465_v23 = vmax.f32 %v407_v19, 0.0 }
 0x1d6   :  { %v466_v25 = vmax.f32 %v409_v21, 0.0 }
 0x1d7   :  { %v489_v26 = vpack.c.bf16 %v465_v23, %v463_v22 }
 0x1d8   :  { %v490_v27 = vpack.c.bf16 %v466_v25, %v464_v24  ;;  %v412_v18 = vpop.f32.mrb[16].mxu1 }
 0x1d9   :  { %v413_v31 = vadd.f32 %v412_v18, %v1442_v33  ;;  %v414_v32 = vpop.f32.mrb[17].mxu1 }
 0x1da   :  { %v415_v35 = vadd.f32 %v414_v32, %v1444_v34  ;;  %v416_v36 = vpop.f32.mrb[18].mxu1  ;;  %690 = vmatprep.mubr.bf16.mxu0 %v490_v27 }
 0x1db   :  { %v467_v37 = vmax.f32 %v413_v31, 0.0  ;;  %v417_v38 = vadd.f32 %v416_v36, %v1442_v33  ;;  %v418_v39 = vpop.f32.mrb[19].mxu1  ;;  %691 = vmatmul.mubr.bf16.gmra.mrb[28].mxu0 %v489_v26  ;;  %v1481_v26 = vld [vmem:[%s1612_s6] ss:$0 sm:$0xff]  ;;  %s1212_s6 = smov [#allocation3]  }
 0x1dc   :  { %v468_v40 = vmax.f32 %v415_v35, 0.0  ;;  %v419_v41 = vadd.f32 %v418_v39, %v1444_v34 }
 0x1dd   :  { %v469_v42 = vmax.f32 %v417_v38, 0.0 }
 0x1de   :  { %v470_v43 = vmax.f32 %v419_v41, 0.0 }
 0x1df   :  { %v491_v44 = vpack.c.bf16 %v469_v42, %v467_v37 }
 0x1e0   :  { %v492_v45 = vpack.c.bf16 %v470_v43, %v468_v40  ;;  %v422_v46 = vpop.f32.mrb[20].mxu1 }
 0x1e1   :  { %v423_v47 = vadd.f32 %v422_v46, %v1442_v33  ;;  %v424_v48 = vpop.f32.mrb[21].mxu1 }
 0x1e2   :  { %v425_v49 = vadd.f32 %v424_v48, %v1444_v34  ;;  %v426_v50 = vpop.f32.mrb[22].mxu1  ;;  %698 = vmatprep.mubr.bf16.mxu0 %v492_v45 }
 0x1e3   :  { %v471_v51 = vmax.f32 %v423_v47, 0.0  ;;  %v427_v52 = vadd.f32 %v426_v50, %v1442_v33  ;;  %v428_v53 = vpop.f32.mrb[23].mxu1  ;;  %699 = vmatmul.mubr.bf16.gmra.mrb[32].mxu0 %v491_v44 }
 0x1e4   :  { %v472_v54 = vmax.f32 %v425_v49, 0.0  ;;  %v429_v55 = vadd.f32 %v428_v53, %v1444_v34 }
 0x1e5   :  { %v473_v56 = vmax.f32 %v427_v52, 0.0 }
 0x1e6   :  { %v474_v57 = vmax.f32 %v429_v55, 0.0 }
 0x1e7   :  { %v493_v58 = vpack.c.bf16 %v473_v56, %v471_v51 }
 0x1e8   :  { %v494_v59 = vpack.c.bf16 %v474_v57, %v472_v54  ;;  %v432_v60 = vpop.f32.mrb[24].mxu1 }
 0x1e9   :  { %v433_v61 = vadd.f32 %v432_v60, %v1442_v33  ;;  %v434_v62 = vpop.f32.mrb[25].mxu1 }
 0x1ea   :  { %v435_v63 = vadd.f32 %v434_v62, %v1444_v34  ;;  %v436_v0 = vpop.f32.mrb[26].mxu1  ;;  %706 = vmatprep.mubr.bf16.mxu0 %v494_v59 }
 0x1eb   :  { %v475_v1 = vmax.f32 %v433_v61, 0.0  ;;  %v437_v2 = vadd.f32 %v436_v0, %v1442_v33  ;;  %v438_v3 = vpop.f32.mrb[27].mxu1  ;;  %707 = vmatmul.mubr.bf16.gmra.mrb[36].mxu0 %v493_v58 }
 0x1ec   :  { %v476_v4 = vmax.f32 %v435_v63, 0.0  ;;  %v439_v5 = vadd.f32 %v438_v3, %v1444_v34 }
 0x1ed   :  { %v477_v6 = vmax.f32 %v437_v2, 0.0 }
 0x1ee   :  { %v478_v7 = vmax.f32 %v439_v5, 0.0 }
 0x1ef   :  { %v495_v8 = vpack.c.bf16 %v477_v6, %v475_v1 }
 0x1f0   :  { %v496_v9 = vpack.c.bf16 %v478_v7, %v476_v4  ;;  %v442_v10 = vpop.f32.mrb[28].mxu1 }
 0x1f1   :  { %v443_v11 = vadd.f32 %v442_v10, %v1442_v33  ;;  %v444_v12 = vpop.f32.mrb[29].mxu1 }
 0x1f2   :  { %v445_v13 = vadd.f32 %v444_v12, %v1444_v34  ;;  %v446_v14 = vpop.f32.mrb[30].mxu1  ;;  %714 = vmatprep.mubr.bf16.mxu0 %v496_v9 }
 0x1f3   :  { %v479_v15 = vmax.f32 %v443_v11, 0.0  ;;  %v447_v16 = vadd.f32 %v446_v14, %v1442_v33  ;;  %v448_v17 = vpop.f32.mrb[31].mxu1  ;;  %715 = vmatmul.mubr.bf16.gmra.mrb[40].mxu0 %v495_v8 }
 0x1f4   :  { %v480_v19 = vmax.f32 %v445_v13, 0.0  ;;  %v449_v20 = vadd.f32 %v448_v17, %v1444_v34  ;;  %v1487_v34 = vld [vmem:[%s1613_s7] ss:$0 sm:$0xff]  ;;  %s979_s7 = sshll.u32 %s1212_s6, 4  ;;  %s980_s7 = int_to_ptr.vmem [resolvable:$true] %s979_s7 }
 0x1f5   :  { %v481_v21 = vmax.f32 %v447_v16, 0.0  ;;  %s1187_s30 = scalar_lea.vmem %s980_s7, 16  ;;  %s1191_s10 = scalar_lea.vmem %s980_s7, 32 }
 0x1f6   :  { %v482_v22 = vmax.f32 %v449_v20, 0.0  ;;  %p1188_p0 = scmp.ne.s32.totalorder %s980_s7, %s1187_s30  ;;  %p1192_p1 = scmp.lt.s32.totalorder %s980_s7, %s980_s7 }
 0x1f7   :  { %v497_v23 = vpack.c.bf16 %v481_v21, %v479_v15  ;;  %p1193_p2 = scmp.lt.s32.totalorder %s1191_s10, %s1187_s30 }
 0x1f8   :  { %v498_v24 = vpack.c.bf16 %v482_v22, %v480_v19 }
 0x1f9   :  { %p1194_p3 = por %p1193_p2, %p1192_p1 }
 0x1fa   :  { %722 = vmatprep.mubr.bf16.mxu1 %v498_v24 }
 0x1fb   :  { %723 = vmatmul.mubr.bf16.vlgmr.msra.gmra.mrb[32].mxu1 %v497_v23  ;;  %p1195_p4 = pnand %p1194_p3, %p1188_p0 }
 0x296   :  { %v1064_v25 = vpop.f32.mrb[16].mxu0 }
 0x297   :  { %v1065_v27 = vpop.f32.mrb[17].mxu0 }
 0x298   :  { %v1066_v18 = vadd.f32 %v1065_v27, %v1064_v25  ;;  %v1067_v33 = vpop.f32.mrb[18].mxu0 }
 0x299   :  { %v1068_v31 = vpop.f32.mrb[19].mxu0 }
 0x29a   :  { %v669_v32 = vadd.f32 %v1066_v18, %v1481_v26  ;;  %v1069_v35 = vadd.f32 %v1068_v31, %v1067_v33 }
 0x29c   :  { %v731_v36 = vmax.f32 %v669_v32, 0.0  ;;  %v672_v37 = vadd.f32 %v1069_v35, %v1481_v26 }
 0x29e   :  { %v732_v38 = vmax.f32 %v672_v37, 0.0  ;;  %v1070_v39 = vpop.f32.mrb[20].mxu0  ;;  %v754_v40 = vmul.f32 %v1487_v34, %v731_v36 }
 0x29f   :  { %v1071_v41 = vpop.f32.mrb[21].mxu0 }
 0x2a0   :  { %v1072_v42 = vadd.f32 %v1071_v41, %v1070_v39  ;;  %v1073_v43 = vpop.f32.mrb[22].mxu0  ;;  %v770_v44 = vsel %vm313_vm1, %v754_v40, 0.0  ;;  %v755_v45 = vmul.f32 %v1487_v34, %v732_v38 }
 0x2a1   :  { %v1074_v46 = vpop.f32.mrb[23].mxu0  ;;  %771 = vadd.xlane.f32.xlu0 %v770_v44  ;;  %v818_v44 = vld [vmem:[#allocation2] sm:$0x1] }
 0x2a2   :  { %v677_v47 = vadd.f32 %v1072_v42, %v1481_v26  ;;  %v1075_v48 = vadd.f32 %v1074_v46, %v1073_v43  ;;  %v773_v51 = vsel %vm313_vm1, %v755_v45, 0.0 }
 0x2a4   :  { %v733_v49 = vmax.f32 %v677_v47, 0.0  ;;  %v680_v50 = vadd.f32 %v1075_v48, %v1481_v26 }
 0x2a5   :  { %774 = vadd.xlane.f32.xlu0 %v773_v51 }
 0x2a6   :  { %v734_v52 = vmax.f32 %v680_v50, 0.0  ;;  %v1076_v53 = vpop.f32.mrb[24].mxu0  ;;  %v756_v54 = vmul.f32 %v1487_v34, %v733_v49 }
 0x2a7   :  { %v1077_v55 = vpop.f32.mrb[25].mxu0 }
 0x2a8   :  { %v1078_v56 = vadd.f32 %v1077_v55, %v1076_v53  ;;  %v1079_v57 = vpop.f32.mrb[26].mxu0  ;;  %v776_v58 = vsel %vm313_vm1, %v756_v54, 0.0  ;;  %v757_v59 = vmul.f32 %v1487_v34, %v734_v52 }
 0x2a9   :  { %v1080_v60 = vpop.f32.mrb[27].mxu0  ;;  %777 = vadd.xlane.f32.xlu1 %v776_v58 }
 0x2aa   :  { %v685_v61 = vadd.f32 %v1078_v56, %v1481_v26  ;;  %v1081_v62 = vadd.f32 %v1080_v60, %v1079_v57  ;;  %v779_v1 = vsel %vm313_vm1, %v757_v59, 0.0 }
 0x2ac   :  { %v735_v63 = vmax.f32 %v685_v61, 0.0  ;;  %v688_v0 = vadd.f32 %v1081_v62, %v1481_v26 }
 0x2ad   :  { %780 = vadd.xlane.f32.xlu1 %v779_v1 }
 0x2ae   :  { %v736_v2 = vmax.f32 %v688_v0, 0.0  ;;  %v1082_v3 = vpop.f32.mrb[28].mxu0  ;;  %v758_v4 = vmul.f32 %v1487_v34, %v735_v63 }
 0x2af   :  { %v1083_v5 = vpop.f32.mrb[29].mxu0 }
 0x2b0   :  { %v1084_v6 = vadd.f32 %v1083_v5, %v1082_v3  ;;  %v1085_v7 = vpop.f32.mrb[30].mxu0  ;;  %v782_v8 = vsel %vm313_vm1, %v758_v4, 0.0  ;;  %v759_v9 = vmul.f32 %v1487_v34, %v736_v2 }
 0x2b1   :  { %v1086_v10 = vpop.f32.mrb[31].mxu0  ;;  %783 = vadd.xlane.f32.xlu0 %v782_v8 }
 0x2b2   :  { %v693_v11 = vadd.f32 %v1084_v6, %v1481_v26  ;;  %v1087_v12 = vadd.f32 %v1086_v10, %v1085_v7  ;;  %v785_v13 = vsel %vm313_vm1, %v759_v9, 0.0 }
 0x2b3   :  { %786 = vadd.xlane.f32.xlu1 %v785_v13 }
 0x2b4   :  { %v737_v14 = vmax.f32 %v693_v11, 0.0  ;;  %v696_v15 = vadd.f32 %v1087_v12, %v1481_v26 }
 0x2b6   :  { %v738_v16 = vmax.f32 %v696_v15, 0.0  ;;  %v1088_v17 = vpop.f32.mrb[32].mxu0  ;;  %v760_v19 = vmul.f32 %v1487_v34, %v737_v14 }
 0x2b7   :  { %v1089_v20 = vpop.f32.mrb[33].mxu0 }
 0x2b8   :  { %v1090_v21 = vadd.f32 %v1089_v20, %v1088_v17  ;;  %v788_v22 = vsel %vm313_vm1, %v760_v19, 0.0  ;;  %v1091_v23 = vpop.f32.mrb[34].mxu0  ;;  %v761_v24 = vmul.f32 %v1487_v34, %v738_v16 }
 0x2b9   :  { %789 = vadd.xlane.f32.xlu0 %v788_v22  ;;  %v1092_v25 = vpop.f32.mrb[35].mxu0 }
 0x2ba   :  { %v701_v27 = vadd.f32 %v1090_v21, %v1481_v26  ;;  %v1093_v18 = vadd.f32 %v1092_v25, %v1091_v23  ;;  %v791_v32 = vsel %vm313_vm1, %v761_v24, 0.0 }
 0x2bc   :  { %v739_v33 = vmax.f32 %v701_v27, 0.0  ;;  %v704_v31 = vadd.f32 %v1093_v18, %v1481_v26  ;;  %v1537_v18 = vand.u32 127, %v263_v28 }
 0x2bd   :  { %792 = vadd.xlane.f32.xlu0 %v791_v32 }
 0x2be   :  { %v740_v35 = vmax.f32 %v704_v31, 0.0  ;;  %v1094_v36 = vpop.f32.mrb[36].mxu0  ;;  %v762_v37 = vmul.f32 %v1487_v34, %v739_v33  ;;  %v866_v32 = vadd.s32 4294967288, %v1537_v18 }
 0x2bf   :  { %v1095_v38 = vpop.f32.mrb[37].mxu0 }
 0x2c0   :  { %v1096_v39 = vadd.f32 %v1095_v38, %v1094_v36  ;;  %v1097_v40 = vpop.f32.mrb[38].mxu0  ;;  %v794_v41 = vsel %vm313_vm1, %v762_v37, 0.0  ;;  %v763_v42 = vmul.f32 %v1487_v34, %v740_v35  ;;  %v873_v35 = vadd.s32 4294967280, %v1537_v18 }
 0x2c1   :  { %v1098_v43 = vpop.f32.mrb[39].mxu0  ;;  %795 = vadd.xlane.f32.xlu0 %v794_v41  ;;  %v869_v28 = vsub.s32 %v866_v32, %v1433_v29 }
 0x2c2   :  { %v709_v45 = vadd.f32 %v1096_v39, %v1481_v26  ;;  %v1099_v46 = vadd.f32 %v1098_v43, %v1097_v40  ;;  %v797_v47 = vsel %vm313_vm1, %v763_v42, 0.0  ;;  %v864_v39 = vsub.s32 %v1537_v18, %v1433_v29 }
 0x2c3   :  { %v876_v41 = vsub.s32 %v873_v35, %v1433_v29  ;;  %v880_v43 = vadd.s32 4294967272, %v1537_v18 }
 0x2c4   :  { %v741_v48 = vmax.f32 %v709_v45, 0.0  ;;  %v712_v49 = vadd.f32 %v1099_v46, %v1481_v26  ;;  %821 = vperm.xlu1 %1148, %v818_v44   ;;  %v887_v46 = vadd.s32 4294967264, %v1537_v18 }
 0x2c5   :  { %798 = vadd.xlane.f32.xlu0 %v797_v47 }
 0x2c6   :  { %v742_v50 = vmax.f32 %v712_v49, 0.0  ;;  %v1100_v51 = vpop.f32.mrb[40].mxu0  ;;  %v764_v52 = vmul.f32 %v1487_v34, %v741_v48  ;;  %v883_v49 = vsub.s32 %v880_v43, %v1433_v29 }
 0x2c7   :  { %v1101_v53 = vpop.f32.mrb[41].mxu0 }
 0x2c8   :  { %v1102_v54 = vadd.f32 %v1101_v53, %v1100_v51  ;;  %v800_v55 = vsel %vm313_vm1, %v764_v52, 0.0  ;;  %v1103_v56 = vpop.f32.mrb[42].mxu0  ;;  %v765_v57 = vmul.f32 %v1487_v34, %v742_v50  ;;  %v894_v51 = vadd.s32 4294967256, %v1537_v18 }
 0x2c9   :  { %801 = vadd.xlane.f32.xlu0 %v800_v55  ;;  %v1104_v58 = vpop.f32.mrb[43].mxu0 }
 0x2ca   :  { %v717_v59 = vadd.f32 %v1102_v54, %v1481_v26  ;;  %v1105_v60 = vadd.f32 %v1104_v58, %v1103_v56  ;;  %v803_v19 = vsel %vm313_vm1, %v765_v57, 0.0  ;;  %v890_v54 = vsub.s32 %v887_v46, %v1433_v29 }
 0x2cb   :  { %v901_v56 = vadd.s32 4294967248, %v1537_v18 }
 0x2cc   :  { %v743_v61 = vmax.f32 %v717_v59, 0.0  ;;  %v720_v62 = vadd.f32 %v1105_v60, %v1481_v26  ;;  %v897_v59 = vsub.s32 %v894_v51, %v1433_v29 }
 0x2ce   :  { %v744_v63 = vmax.f32 %v720_v62, 0.0  ;;  %v1106_v0 = vpop.f32.mrb[32].mxu1  ;;  %v766_v1 = vmul.f32 %v1487_v34, %v743_v61  ;;  %v904_v62 = vsub.s32 %v901_v56, %v1433_v29 }
 0x2cf   :  { %v1107_v2 = vpop.f32.mrb[33].mxu1 }
 0x2d0   :  { %v1108_v3 = vadd.f32 %v1107_v2, %v1106_v0  ;;  %v1109_v4 = vpop.f32.mrb[34].mxu1  ;;  %v806_v5 = vsel %vm313_vm1, %v766_v1, 0.0  ;;  %v767_v6 = vmul.f32 %v1487_v34, %v744_v63  ;;  %v908_v63 = vadd.s32 4294967240, %v1537_v18 }
 0x2d1   :  { %v1110_v7 = vpop.f32.mrb[35].mxu1  ;;  %807 = vadd.xlane.f32.xlu0 %v806_v5  ;;  %v915_v2 = vadd.s32 4294967232, %v1537_v18  ;;  %v929_v5 = vadd.s32 4294967216, %v1537_v18 }
 0x2d2   :  { %v725_v8 = vadd.f32 %v1108_v3, %v1481_v26  ;;  %v1111_v9 = vadd.f32 %v1110_v7, %v1109_v4  ;;  %v809_v10 = vsel %vm313_vm1, %v767_v6, 0.0  ;;  %v922_v4 = vadd.s32 4294967224, %v1537_v18 }
 0x2d3   :  { %v911_v7 = vsub.s32 %v908_v63, %v1433_v29 }
 0x2d4   :  { %v745_v11 = vmax.f32 %v725_v8, 0.0  ;;  %v728_v12 = vadd.f32 %v1111_v9, %v1481_v26 }
 0x2d5   :  { %810 = vadd.xlane.f32.xlu0 %v809_v10  ;;  %v918_v10 = vsub.s32 %v915_v2, %v1433_v29 }
 0x2d6   :  { %v746_v13 = vmax.f32 %v728_v12, 0.0  ;;  %v768_v14 = vmul.f32 %v1487_v34, %v745_v11 }
 0x2d8   :  { %v812_v15 = vsel %vm313_vm1, %v768_v14, 0.0  ;;  %v769_v16 = vmul.f32 %v1487_v34, %v746_v13  ;;  %v925_v13 = vsub.s32 %v922_v4, %v1433_v29 }
 0x2d9   :  { %813 = vadd.xlane.f32.xlu0 %v812_v15  ;;  %v936_v15 = vadd.s32 4294967208, %v1537_v18 }
 0x2da   :  { %v815_v17 = vsel %vm313_vm1, %v769_v16, 0.0 }
 0x2dd   :  { %816 = vadd.xlane.f32.xlu0 %v815_v17  ;;  %v932_v17 = vsub.s32 %v929_v5, %v1433_v29 }
 0x2e8   :  { %804 = vadd.xlane.f32.xlu1 %v803_v19 }
 0x32e   :  { %v772_v20 = vpop.xlane.xlu0 %771 }
 0x332   :  { %v775_v21 = vpop.xlane.xlu0 %774 }
 0x336   :  { %v778_v22 = vpop.xlane.xlu1 %777 }
 0x33a   :  { %v781_v24 = vpop.xlane.xlu1 %780 }
 0x33e   :  { %v784_v23 = vpop.xlane.xlu0 %783 }
 0x340   :  { %v787_v25 = vpop.xlane.xlu1 %786 }
 0x344   :  { %v822_v33 = vpop.permute.xlu1 %821 }
 0x345   :  { %v1541_v31 = vrot.slane %v822_v33, %v265_v30  ;;  %v939_v33 = vsub.s32 %v936_v15, %v1433_v29 }
 0x346   :  { %v790_v26 = vpop.xlane.xlu0 %789 }
 0x347   :  { %v828_v37 = vadd.f32 %v1541_v31, %v772_v20  ;;  %v829_v38 = vadd.f32 %v1541_v31, %v775_v21  ;;  %v830_v40 = vadd.f32 %v1541_v31, %v778_v22  ;;  %v831_v47 = vadd.f32 %v1541_v31, %v781_v24 }
 0x348   :  { %v832_v52 = vadd.f32 %v1541_v31, %v784_v23  ;;  %v833_v57 = vadd.f32 %v1541_v31, %v787_v25  ;;  %v834_v1 = vadd.f32 %v1541_v31, %v790_v26  ;;  %v943_v20 = vadd.s32 4294967200, %v1537_v18 }
 0x349   :  { %v865_v30 = vrot.slane %v828_v37, %v864_v39  ;;  %v870_v42 = vrot.slane %v829_v38, %v869_v28  ;;  %v877_v45 = vrot.slane %v830_v40, %v876_v41  ;;  %v884_v55 = vrot.slane %v831_v47, %v883_v49 }
 0x34a   :  { %v793_v27 = vpop.xlane.xlu0 %792  ;;  %v891_v60 = vrot.slane %v832_v52, %v890_v54  ;;  %v898_v3 = vrot.slane %v833_v57, %v897_v59  ;;  %v905_v9 = vrot.slane %v834_v1, %v904_v62  ;;  %v950_v22 = vadd.s32 4294967192, %v1537_v18 }
 0x34b   :  { %v872_v48 = vsel %vm871_vm2, %v870_v42, %v865_v30  ;;  %v835_v8 = vadd.f32 %v1541_v31, %v793_v27  ;;  %v957_v23 = vadd.s32 4294967184, %v1537_v18  ;;  %v964_v24 = vadd.s32 4294967176, %v1537_v18 }
 0x34c   :  { %v879_v53 = vsel %vm878_vm3, %v877_v45, %v872_v48  ;;  %v946_v32 = vsub.s32 %v943_v20, %v1433_v29  ;;  %v953_v38 = vsub.s32 %v950_v22, %v1433_v29 }
 0x34d   :  { %v886_v58 = vsel %vm885_vm4, %v884_v55, %v879_v53  ;;  %v912_v21 = vrot.slane %v835_v8, %v911_v7  ;;  %v960_v28 = vsub.s32 %v957_v23, %v1433_v29  ;;  %v967_v30 = vsub.s32 %v964_v24, %v1433_v29 }
 0x34e   :  { %v796_v34 = vpop.xlane.xlu0 %795  ;;  %v893_v0 = vsel %vm892_vm5, %v891_v60, %v886_v58 }
 0x34f   :  { %v900_v6 = vsel %vm899_vm6, %v898_v3, %v893_v0  ;;  %v836_v11 = vadd.f32 %v1541_v31, %v796_v34 }
 0x350   :  { %v907_v16 = vsel %vm906_vm7, %v905_v9, %v900_v6 }
 0x351   :  { %v919_v26 = vrot.slane %v836_v11, %v918_v10  ;;  %v914_v25 = vsel %vm913_vm8, %v912_v21, %v907_v16 }
 0x352   :  { %v799_v36 = vpop.xlane.xlu0 %798 }
 0x353   :  { %v837_v14 = vadd.f32 %v1541_v31, %v799_v36  ;;  %v921_v40 = vsel %vm920_vm9, %v919_v26, %v914_v25 }
 0x355   :  { %v926_v27 = vrot.slane %v837_v14, %v925_v13 }
 0x356   :  { %v802_v44 = vpop.xlane.xlu0 %801 }
 0x357   :  { %v838_v19 = vadd.f32 %v1541_v31, %v802_v44  ;;  %v928_v42 = vsel %vm927_vm10, %v926_v27, %v921_v40 }
 0x359   :  { %v933_v34 = vrot.slane %v838_v19, %v932_v17 }
 0x35b   :  { %v935_v45 = vsel %vm934_vm11, %v933_v34, %v928_v42 }
 0x35e   :  { %v808_v50 = vpop.xlane.xlu0 %807 }
 0x35f   :  { %v840_v35 = vadd.f32 %v1541_v31, %v808_v50 }
 0x361   :  { %v947_v46 = vrot.slane %v840_v35, %v946_v32 }
 0x362   :  { %v811_v61 = vpop.xlane.xlu0 %810 }
 0x363   :  { %v841_v39 = vadd.f32 %v1541_v31, %v811_v61 }
 0x365   :  { %v954_v47 = vrot.slane %v841_v39, %v953_v38 }
 0x366   :  { %v814_v12 = vpop.xlane.xlu0 %813 }
 0x367   :  { %v842_v41 = vadd.f32 %v1541_v31, %v814_v12 }
 0x369   :  { %v961_v49 = vrot.slane %v842_v41, %v960_v28 }
 0x36a   :  { %v817_v36 = vpop.xlane.xlu0 %816 }
 0x36b   :  { %v843_v43 = vadd.f32 %v1541_v31, %v817_v36 }
 0x36d   :  { %v968_v29 = vrot.slane %v843_v43, %v967_v30 }
 0x375   :  { %v805_v37 = vpop.xlane.xlu1 %804 }
 0x376   :  { %v839_v18 = vadd.f32 %v1541_v31, %v805_v37 }
 0x378   :  { %v940_v44 = vrot.slane %v839_v18, %v939_v33 }
 0x37a   :  { %v942_v48 = vsel %vm941_vm12, %v940_v44, %v935_v45 }
 0x37b   :  { %v949_v50 = vsel %vm948_vm13, %v947_v46, %v942_v48 }
 0x37c   :  { %v956_v51 = vsel %vm955_vm14, %v954_v47, %v949_v50 }
 0x37d   :  { %v963_v52 = vsel %vm962_vm15, %v961_v49, %v956_v51 }
 0x37e   :  { %v970_v53 = vsel %vm969_vm0, %v968_v29, %v963_v52 }
 0x37f   :  { %972 = vst [vmem:[#allocation3] sm:$0x1] %v970_v53 }
 0x380   :  { %1198 = shalt.err (!%p1195_p4)
}
 0x381   :  { %s1199_s13 = scalar_lea.hbm %s1615_s9, 16 }
 0x382   :  { %p1200_p5 = scmp.ne.s32.totalorder %s1615_s9, %s1199_s13  ;;  %p1203_p6 = scmp.lt.u32.totalorder %s1199_s13, %s1615_s9 }
 0x384   :  { %p1205_p7 = pnand %p1203_p6, %p1200_p5 }
 0x386   :  { %1208 = shalt.err (!%p1205_p7)
}
 0x387   :  { %982 = dma.vmem_to_hbm [thread:$0]  %s980_s7, 16, %s1615_s9, [#allocation4]  }
 0x388   :  { %1209 = dma.done.wait [#allocation4], 16  }
 0x389   :  { %1210 = vsyncadd [#allocation4], 4294967280 }
 0x38a   :  { %986 = vsyncpa [#allocation4], 1 }

</bundles_post_ra>
